<compile_context>
chip_gen: v6e
topology: v6e:2x2x1
jax: 0.10.0
libtpu: 0.0.40
codegen_flags: <defaults>
</compile_context>

<pallas_src>
import functools
import math

import jax
import jax.numpy as jnp
from jax.experimental import pallas as pl
from jax.experimental.pallas import tpu as pltpu

LN_EPS = 1e-5  # nn.LayerNorm default


def _patch_embed_kernel(p_ref, w_ref, b_ref, g_ref, beta_ref, o_ref, *, e_real):
    """One tile of tokens: conv-as-matmul (bf16 -> f32 acc) + bias + LayerNorm.

    The embedding axis may be zero-padded to a multiple of 128 lanes; the
    LayerNorm statistics are computed over the real `e_real` columns only.
    """
    acc = jnp.dot(p_ref[...], w_ref[...], preferred_element_type=jnp.float32)
    acc = acc + b_ref[...]  # bias broadcast (1, E_pad); padded cols stay 0

    e_pad = acc.shape[-1]
    inv_e = 1.0 / e_real
    # Padded columns of acc are exactly zero (zero weight cols + zero bias),
    # so the row sum over the padded width equals the sum over real columns.
    mean = jnp.sum(acc, axis=-1, keepdims=True) * inv_e
    col = jax.lax.broadcasted_iota(jnp.int32, (1, e_pad), 1)
    valid = col < e_real
    centered = jnp.where(valid, acc - mean, 0.0)          # mask padded cols
    var = jnp.sum(centered * centered, axis=-1, keepdims=True) * inv_e
    inv = jax.lax.rsqrt(var + LN_EPS)
    # gamma/beta are zero-padded, so padded output columns are written as 0.
    o_ref[...] = (centered * inv * g_ref[...] + beta_ref[...]).astype(o_ref.dtype)


def _im2col_nchw(x, kernel_size, stride, padding):
    """Extract overlapping patches (glue / plain JAX).

    x: (B, C, H, W) -> (B*Ho*Wo, C*kh*kw), feature order = (C, kh, kw),
    matching PyTorch Conv2d weight layout (E, C, kh, kw) flattened.
    """
    B, C, H, W = x.shape
    kh = kw = kernel_size
    sh = sw = stride
    ph = pw = padding
    Ho = (H + 2 * ph - kh) // sh + 1
    Wo = (W + 2 * pw - kw) // sw + 1

    x_pad = jnp.pad(x, ((0, 0), (0, 0), (ph, ph), (pw, pw)))
    cols = []
    for ki in range(kh):
        for kj in range(kw):
            sl = x_pad[:, :,
                       ki:ki + (Ho - 1) * sh + 1:sh,
                       kj:kj + (Wo - 1) * sw + 1:sw]  # (B, C, Ho, Wo)
            cols.append(sl)
    cols = jnp.stack(cols, axis=2)                       # (B, C, kh*kw, Ho, Wo)
    cols = jnp.transpose(cols, (0, 3, 4, 1, 2))          # (B, Ho, Wo, C, kh*kw)
    patches = cols.reshape(B * Ho * Wo, C * kh * kw)
    return patches, Ho, Wo


def _round_up(v, m):
    return ((v + m - 1) // m) * m


def _pad_cols(a, e_pad):
    """Zero-pad the last axis of a 1-D parameter vector up to e_pad."""
    e = a.shape[-1]
    if e_pad != e:
        a = jnp.pad(a, (0, e_pad - e))
    return a.reshape(1, e_pad)


def _pick_tile_m(M, K, E_pad):
    """Largest token tile (<=512, multiple of 8) fitting a conservative VMEM budget."""
    def vmem_need(t):
        return (2 * t * K * 2          # patches (bf16), double-buffered
                + 2 * K * E_pad * 2    # weight (bf16), double-buffered
                + 2 * t * E_pad * 4    # output (f32), double-buffered
                + 3 * 2 * E_pad * 4)   # bias / gamma / beta rows

    tile = min(512, _round_up(M, 8))
    # 24 MiB budget: comfortably under v7x's 64 MiB physical / 32 MiB scoped VMEM.
    while tile > 8 and vmem_need(tile) > 24 * 1024 * 1024:
        tile -= 8
    # v7x has 2 TensorCores: keep >= 2 parallel grid steps when possible so the
    # token axis shards across both cores.
    if pl.cdiv(M, tile) < 2 and M > 8:
        tile = max(8, _round_up(pl.cdiv(M, 2), 8))
    return tile


@functools.partial(jax.jit, static_argnames=("kernel_size", "stride", "padding"))
def overlap_patch_embed(x, conv_w, conv_b, ln_w, ln_b, *,
                        kernel_size, stride, padding):
    """Forward of OverlapPatchEmbed (non-DCN path).

    x      : (B, C, H, W) float32      (NCHW, same as PyTorch)
    conv_w : (E, C, kh, kw)
    conv_b : (E,)
    ln_w   : (E,)   LayerNorm weight (gamma)
    ln_b   : (E,)   LayerNorm bias   (beta)
    returns (tokens, Ho, Wo) with tokens: (B, Ho*Wo, E)
    """
    B, C, H, W = x.shape
    E = conv_w.shape[0]

    # bf16 matmul operands: halves the bytes of the dominant (M, K) HBM
    # read (and the im2col intermediate).  Accumulation stays f32.
    x_bf16 = x.astype(jnp.bfloat16)
    patches, Ho, Wo = _im2col_nchw(x_bf16, kernel_size, stride, padding)
    M, K = patches.shape

    # Lane-dense output: pad E up to a multiple of 128 with zero columns.
    E_pad = _round_up(E, 128)
    w_flat = conv_w.reshape(E, K).T.astype(jnp.bfloat16)   # (K, E)
    if E_pad != E:
        w_flat = jnp.pad(w_flat, ((0, 0), (0, E_pad - E)))
    b_row = _pad_cols(conv_b.astype(jnp.float32), E_pad)
    g_row = _pad_cols(ln_w.astype(jnp.float32), E_pad)
    beta_row = _pad_cols(ln_b.astype(jnp.float32), E_pad)

    tile_m = _pick_tile_m(M, K, E_pad)
    grid = (pl.cdiv(M, tile_m),)   # ragged final block masked by Pallas; no M pad

    out = pl.pallas_call(
        functools.partial(_patch_embed_kernel, e_real=E),
        out_shape=jax.ShapeDtypeStruct((M, E_pad), jnp.float32),
        grid_spec=pltpu.PrefetchScalarGridSpec(
            num_scalar_prefetch=0,
            grid=grid,
            in_specs=[
                pl.BlockSpec((tile_m, K), lambda i: (i, 0)),      # patches tile (bf16)
                pl.BlockSpec((K, E_pad), lambda i: (0, 0)),       # conv weight (resident)
                pl.BlockSpec((1, E_pad), lambda i: (0, 0)),       # conv bias
                pl.BlockSpec((1, E_pad), lambda i: (0, 0)),       # LN gamma
                pl.BlockSpec((1, E_pad), lambda i: (0, 0)),       # LN beta
            ],
            out_specs=pl.BlockSpec((tile_m, E_pad), lambda i: (i, 0)),
        ),
        compiler_params=pltpu.CompilerParams(
            dimension_semantics=("parallel",),
            vmem_limit_bytes=32 * 1024 * 1024),
    )(patches, w_flat, b_row, g_row, beta_row)

    tokens = out[:, :E].reshape(B, Ho * Wo, E)
    return tokens, Ho, Wo


def init_params(key, in_chans, embed_dim, kernel_size):
    """Deterministic init matching OverlapPatchEmbed._init_weights."""
    kh = kw = kernel_size
    fan_out = kh * kw * embed_dim  # groups == 1
    std = math.sqrt(2.0 / fan_out)
    conv_w = std * jax.random.normal(
        key, (embed_dim, in_chans, kh, kw), dtype=jnp.float32)
    conv_b = jnp.zeros((embed_dim,), dtype=jnp.float32)
    ln_w = jnp.ones((embed_dim,), dtype=jnp.float32)
    ln_b = jnp.zeros((embed_dim,), dtype=jnp.float32)
    return conv_w, conv_b, ln_w, ln_b


def _reference(x, conv_w, conv_b, ln_w, ln_b, *, stride, padding):
    """Plain-JAX f32 reference (conv + flatten/transpose + LayerNorm)."""
    y = jax.lax.conv_general_dilated(
        x, conv_w, window_strides=(stride, stride),
        padding=((padding, padding), (padding, padding)),
        dimension_numbers=("NCHW", "OIHW", "NCHW"))
    y = y + conv_b[None, :, None, None]
    B, E, Ho, Wo = y.shape
    t = jnp.transpose(y.reshape(B, E, Ho * Wo), (0, 2, 1))
    mean = jnp.mean(t, axis=-1, keepdims=True)
    var = jnp.mean((t - mean) ** 2, axis=-1, keepdims=True)
    t = (t - mean) * jax.lax.rsqrt(var + LN_EPS) * ln_w + ln_b
    return t, Ho, Wo


if __name__ == "__main__":
    # Small, module-consistent config: img 16x16, patch 7, stride 4,
    # 4 input channels, embed_dim 32.  (use_dcn=False path.)
    B, C, Hin, Win = 2, 4, 16, 16
    patch_size, stride, embed_dim = 7, 4, 32
    padding = patch_size // 2

    key = jax.random.PRNGKey(0)
    kx, kw = jax.random.split(key)
    x = jax.random.normal(kx, (B, C, Hin, Win), dtype=jnp.float32)
    conv_w, conv_b, ln_w, ln_b = init_params(kw, C, embed_dim, patch_size)

    tokens, Ho, Wo = overlap_patch_embed(
        x, conv_w, conv_b, ln_w, ln_b,
        kernel_size=patch_size, stride=stride, padding=padding)
    tokens = jax.block_until_ready(tokens)

    assert tokens.shape == (B, Ho * Wo, embed_dim), tokens.shape
    assert Ho == (Hin + 2 * padding - patch_size) // stride + 1

    # Correctness sanity check vs. f32 reference (loose tol for bf16 matmul).
    ref, Ho_r, Wo_r = _reference(x, conv_w, conv_b, ln_w, ln_b,
                                 stride=stride, padding=padding)
    assert (Ho, Wo) == (Ho_r, Wo_r)
    max_err = float(jnp.max(jnp.abs(tokens - ref)))
    assert max_err < 5e-2, f"max abs err {max_err}"

    print("KERNEL_OK")
</pallas_src>

<mosaic_0001>
module attributes {stable_mosaic.version = 11 : i64} {
  func.func @_patch_embed_kernel(%arg0: i32, %arg1: memref<16x196xbf16, #tpu.memory_space<vmem>>, %arg2: memref<196x128xbf16, #tpu.memory_space<vmem>>, %arg3: memref<1x128xf32, #tpu.memory_space<vmem>>, %arg4: memref<1x128xf32, #tpu.memory_space<vmem>>, %arg5: memref<1x128xf32, #tpu.memory_space<vmem>>, %arg6: memref<16x128xf32, #tpu.memory_space<vmem>>) attributes {dimension_semantics = [#tpu.dimension_semantics<parallel>], iteration_bounds = array<i64: 2>, scalar_prefetch = 0 : i64, scratch_operands = 0 : i64, tpu.core_type = #tpu.core_type<tc>, window_params = [{transform_indices = @transform_0, window_bounds = array<i64: 16, 196>}, {pipeline_mode = #tpu.pipeline_mode<synchronous>, transform_indices = @transform_1, window_bounds = array<i64: 196, 128>}, {pipeline_mode = #tpu.pipeline_mode<synchronous>, transform_indices = @transform_2, window_bounds = array<i64: 1, 128>}, {pipeline_mode = #tpu.pipeline_mode<synchronous>, transform_indices = @transform_3, window_bounds = array<i64: 1, 128>}, {pipeline_mode = #tpu.pipeline_mode<synchronous>, transform_indices = @transform_4, window_bounds = array<i64: 1, 128>}, {transform_indices = @transform_5, window_bounds = array<i64: 16, 128>}]} {
    %c0 = arith.constant 0 : index
    %c0_0 = arith.constant 0 : index
    %0 = vector.load %arg1[%c0, %c0_0] : memref<16x196xbf16, #tpu.memory_space<vmem>>, vector<16x196xbf16>
    %c0_1 = arith.constant 0 : index
    %c0_2 = arith.constant 0 : index
    %1 = vector.load %arg2[%c0_1, %c0_2] : memref<196x128xbf16, #tpu.memory_space<vmem>>, vector<196x128xbf16>
    %cst = arith.constant dense<0.000000e+00> : vector<16x128xf32>
    %2 = tpu.matmul %0, %1, %cst {dimension_numbers = #tpu.dot_dimension_numbers<[1], [0], [0], [1], [0, 0, 1, 1], [], []>} : vector<16x196xbf16>, vector<196x128xbf16>, vector<16x128xf32> -> vector<16x128xf32>
    %c0_3 = arith.constant 0 : index
    %c0_4 = arith.constant 0 : index
    %3 = vector.load %arg3[%c0_3, %c0_4] : memref<1x128xf32, #tpu.memory_space<vmem>>, vector<1x128xf32>
    %4 = vector.broadcast %3 : vector<1x128xf32> to vector<16x128xf32>
    %5 = arith.addf %2, %4 : vector<16x128xf32>
    %cst_5 = arith.constant dense<0.000000e+00> : vector<16xf32>
    %6 = vector.multi_reduction <add>, %5, %cst_5 [1] : vector<16x128xf32> to vector<16xf32>
    %7 = vector.shape_cast %6 : vector<16xf32> to vector<16x1xf32>
    %cst_6 = arith.constant 3.125000e-02 : f32
    %8 = vector.broadcast %cst_6 : f32 to vector<16x1xf32>
    %9 = arith.mulf %7, %8 : vector<16x1xf32>
    %10 = tpu.iota {dimensions = array<i32: 1>} : vector<1x128xi32>
    %c32_i32 = arith.constant 32 : i32
    %11 = vector.broadcast %c32_i32 : i32 to vector<1x128xi32>
    %12 = arith.cmpi slt, %10, %11 : vector<1x128xi32>
    %13 = vector.broadcast %9 : vector<16x1xf32> to vector<16x128xf32>
    %14 = arith.subf %5, %13 : vector<16x128xf32>
    %cst_7 = arith.constant 0.000000e+00 : f32
    %15 = vector.shape_cast %12 : vector<1x128xi1> to vector<1x128xi1>
    %16 = vector.broadcast %15 : vector<1x128xi1> to vector<16x128xi1>
    %17 = vector.broadcast %cst_7 : f32 to vector<16x128xf32>
    %18 = arith.select %16, %14, %17 : vector<16x128xi1>, vector<16x128xf32>
    %19 = arith.mulf %18, %18 : vector<16x128xf32>
    %cst_8 = arith.constant dense<0.000000e+00> : vector<16xf32>
    %20 = vector.multi_reduction <add>, %19, %cst_8 [1] : vector<16x128xf32> to vector<16xf32>
    %21 = vector.shape_cast %20 : vector<16xf32> to vector<16x1xf32>
    %cst_9 = arith.constant 3.125000e-02 : f32
    %22 = vector.broadcast %cst_9 : f32 to vector<16x1xf32>
    %23 = arith.mulf %21, %22 : vector<16x1xf32>
    %cst_10 = arith.constant 9.99999974E-6 : f32
    %24 = vector.broadcast %cst_10 : f32 to vector<16x1xf32>
    %25 = arith.addf %23, %24 : vector<16x1xf32>
    %26 = math.rsqrt %25 : vector<16x1xf32>
    %27 = vector.broadcast %26 : vector<16x1xf32> to vector<16x128xf32>
    %28 = arith.mulf %18, %27 : vector<16x128xf32>
    %c0_11 = arith.constant 0 : index
    %c0_12 = arith.constant 0 : index
    %29 = vector.load %arg4[%c0_11, %c0_12] : memref<1x128xf32, #tpu.memory_space<vmem>>, vector<1x128xf32>
    %30 = vector.broadcast %29 : vector<1x128xf32> to vector<16x128xf32>
    %31 = arith.mulf %28, %30 : vector<16x128xf32>
    %c0_13 = arith.constant 0 : index
    %c0_14 = arith.constant 0 : index
    %32 = vector.load %arg5[%c0_13, %c0_14] : memref<1x128xf32, #tpu.memory_space<vmem>>, vector<1x128xf32>
    %33 = vector.broadcast %32 : vector<1x128xf32> to vector<16x128xf32>
    %34 = arith.addf %31, %33 : vector<16x128xf32>
    %c0_15 = arith.constant 0 : index
    %c0_16 = arith.constant 0 : index
    %35 = vector.load %arg6[%c0_15, %c0_16] : memref<16x128xf32, #tpu.memory_space<vmem>>, vector<16x128xf32>
    tpu.vector_store %arg6[%c0_15, %c0_16], %34 {strides = array<i32>} : memref<16x128xf32, #tpu.memory_space<vmem>>, vector<16x128xf32>,
    return
  }
  func.func @transform_0(%arg0: i32) -> (i32, i32) {
    %c0_i32 = arith.constant 0 : i32
    %c0_i32_0 = arith.constant 0 : i32
    return %arg0, %c0_i32 : i32, i32
  }
  func.func @transform_1(%arg0: i32) -> (i32, i32) {
    %c0_i32 = arith.constant 0 : i32
    %c0_i32_0 = arith.constant 0 : i32
    %c0_i32_1 = arith.constant 0 : i32
    return %c0_i32, %c0_i32_0 : i32, i32
  }
  func.func @transform_2(%arg0: i32) -> (i32, i32) {
    %c0_i32 = arith.constant 0 : i32
    %c0_i32_0 = arith.constant 0 : i32
    %c0_i32_1 = arith.constant 0 : i32
    return %c0_i32, %c0_i32_0 : i32, i32
  }
  func.func @transform_3(%arg0: i32) -> (i32, i32) {
    %c0_i32 = arith.constant 0 : i32
    %c0_i32_0 = arith.constant 0 : i32
    %c0_i32_1 = arith.constant 0 : i32
    return %c0_i32, %c0_i32_0 : i32, i32
  }
  func.func @transform_4(%arg0: i32) -> (i32, i32) {
    %c0_i32 = arith.constant 0 : i32
    %c0_i32_0 = arith.constant 0 : i32
    %c0_i32_1 = arith.constant 0 : i32
    return %c0_i32, %c0_i32_0 : i32, i32
  }
  func.func @transform_5(%arg0: i32) -> (i32, i32) {
    %c0_i32 = arith.constant 0 : i32
    %c0_i32_0 = arith.constant 0 : i32
    return %arg0, %c0_i32 : i32, i32
  }
}

</mosaic_0001>

<bundles_post_ra>
// kernel: overlap_patch_embed.1
= control target key start
LH: loop header
LB: loop body
LE: loop exit
PB: predicated region body
PF: predicated region fallthrough
CT: control target
= control target key end

     0   :  { %10 = vsyncpa [#allocation3], 0  ;;  %s867_s0 = inlined_call_operand.vmem [shape: bf16[32,196], index: 0, kind: input, shape index: {}]   ;;  %s868_s1 = inlined_call_operand.vmem [shape: bf16[196,128], index: 1, kind: input, shape index: {}]   ;;  %s869_s2 = inlined_call_operand.vmem [shape: f32[1,128], index: 2, kind: input, shape index: {}]   ;;  %s870_s3 = inlined_call_operand.vmem [shape: f32[1,128], index: 3, kind: input, shape index: {}]   ;;  %s871_s4 = inlined_call_operand.vmem [shape: f32[1,128], index: 4, kind: input, shape index: {}]   ;;  %s872_s5 = inlined_call_operand.hbm [shape: f32[32,128], index: 5, kind: output, shape index: {}]  }
   0x1   :  { %12 = vsyncpa [#allocation3 + $0x1], 0  ;;  %s714_s18 = smov 0   ;;  %s716_s19 = smov 0  }
   0x2   :  { %s718_s20 = smov 0   ;;  %s720_s21 = smov 0  }
   0x3 LB: > { %s735_s22 = sadd.s32 4294967295, %s678_s21   ;;  %s522_s23 = sadd.s32 4294967294, %s678_s21   ;;  %s678_s21 = sphi %s720_s21, %s878_s21   ;;  %s674_s20 = sphi %s718_s20, %s877_s20   ;;  %s670_s19 = sphi %s716_s19, %s876_s19   ;;  %s666_s18 = sphi %s714_s18, %s875_s18  }
   0x4   : > { %s739_s24 = sadd.s32 1, %s678_s21   ;;  %s135_s25 = sadd.s32 1, %s674_s20 }
   0x5   : > { %s132_s26 = ssub.s32 %s678_s21, %s739_s24  ;;  %p145_p0 = scmp.ne.s32.totalorder %s674_s20, %s670_s19 }
   0x6   : > { %p133_p1 = scmp.eq.s32.totalorder %s132_s26, 0  ;;  %p146_p2 = scmp.eq.s32.totalorder %s735_s22, 1 }
   0x7   : > { %p151_p3 = scmp.ne.s32.totalorder %s670_s19, %s666_s18  ;;  %p152_p4 = scmp.eq.s32.totalorder %s522_s23, 1 }
   0x8   : > { %s750_s27 = scalar_select %p133_p1, %s674_s20, %s135_s25  }
   0x9   : > { %p752_p5 = por %p146_p2, %p145_p0  ;;  %p756_p6 = por %p152_p4, %p151_p3 }
   0xa   : > { %p525_p7 = scmp.ge.s32.totalorder %s678_s21, 1  ;;  %p192_p8 = scmp.lt.s32.totalorder %s678_s21, 3 }
   0xc   : > { %p193_p9 = pnand %p525_p7, %p192_p8 }
   0xd   : > { %s527_s9 = sshll.u32 (!%p193_p9), %s735_s22, 1 }
   0xe   : > { %196 = sbr.rel (%p193_p9) target bundleno = 592 (0x250), region = 40  ;;  %p222_p10 = scmp.lt.s32.totalorder (!%p193_p9), %s527_s9, 3 }
  0x13   : > { %v598_v0 = vld [vmem:[%s868_s1 + $0x38] sm:$0xff]   ;;  %v680_v1 = vmov 0   ;;  %v599_v2 = vld [vmem:[%s868_s1 + $0x30] sm:$0xff]   ;;  %s880_s9 = smov (!%p222_p10, %s527_s9), 3  ;;  %v600_v3 = vld [vmem:[%s868_s1 + $0x28] sm:$0xff]   ;;  %vm348_vm0 = vcmask 556032   ;;  %v403_v24 = vlaneseq }
  0x14   : > { %356 = vmatprep.subr.bf16.mxu0 %v680_v1  ;;  %s554_s12 = sshll.u32 %s880_s9, 3  ;;  %v601_v4 = vld [vmem:[%s868_s1 + $0x20] sm:$0xff]   ;;  %v602_v6 = vld [vmem:[%s868_s1 + $0x18] sm:$0xff]   ;;  %v603_v7 = vld [vmem:[%s868_s1 + $0x10] sm:$0xff]   ;;  %vm352_vm1 = vcmask 1041408  }
  0x15   : > { %357 = vmatpush1.bf16.msra.mxu0 %v598_v0  ;;  %s778_s17 = scalar_lea.vmem %s867_s0, %s554_s12  ;;  %v604_v8 = vld [vmem:[%s868_s1 + $0x8] sm:$0xff]   ;;  %v605_v9 = vld [vmem:[%s868_s1] sm:$0xff]   ;;  %v607_v12 = vld [vmem:[%s868_s1 + $0x58] sm:$0xff]   ;;  %v404_v25 = vand.u32 127, %v403_v24  ;;  %s555_s12 = sshll.u32 %s735_s22, 8 }
  0x16   : > { %358 = vmatprep.subr.bf16.mxu0 %v680_v1  ;;  %v613_v5 = vld [vmem:[%s778_s17 + $0x4] ss:$8 sps:$4 sm:$0xff]   ;;  %v606_v10 = vld [vmem:[%s868_s1 + $0x60] ss:$0 sps:$4 sm:$0x33]   ;;  %v608_v13 = vld [vmem:[%s868_s1 + $0x50] sm:$0xff]   ;;  %s823_s23 = scalar_lea.hbm %s872_s5, %s555_s12 }
  0x17   : > { %546 = vmatprep.mubr.msk.bf16.mxu0 %vm348_vm0, %v613_v5  ;;  %v354_v11 = vsel %vm352_vm1, %v606_v10, 0  ;;  %v609_v14 = vld [vmem:[%s868_s1 + $0x48] sm:$0xff]   ;;  %v610_v15 = vld [vmem:[%s868_s1 + $0x40] sm:$0xff]   ;;  %vm405_vm2 = vcmp.lt.s32.totalorder %v404_v25, 32  ;;  %s681_s22 = smov [#allocation2]  }
  0x18   : > { %v611_v16 = vld [vmem:[%s778_s17] ss:$8 sps:$4 sm:$0xff]   ;;  %s218_s17 = sand.u32 1, %s670_s19   ;;  %s622_s30 = sshll.u32 %s681_s22, 4  ;;  %s623_s30 = int_to_ptr.vmem [resolvable:$false] %s622_s30 }
  0x19   : > { %359 = vmatpush1.bf16.msra.mxu0 %v599_v2  ;;  %v530_v17 = vld [vmem:[%s869_s2] ss:$0 sm:$0xff]  ;;  %s526_s9 = sshll.u32 %s218_s17, 4  ;;  %s827_s25 = scalar_lea.sflag [#allocation3], %s218_s17 }
  0x1a   : > { %360 = vmatprep.subr.bf16.mxu0 %v680_v1  ;;  %v547_v43 = vld [vmem:[%s870_s3] ss:$0 sm:$0xff]  ;;  %s220_s13 = scalar_lea.vmem [#allocation2], %s526_s9  ;;  %s624_s6 = scalar_lea.vmem %s623_s30, 512 }
  0x1b   : > { %v548_v45 = vld [vmem:[%s871_s4] ss:$0 sm:$0xff]  ;;  %s460_s14 = sshll.u32 %s220_s13, 4  ;;  %s825_s14 = int_to_ptr.vmem [resolvable:$true] %s460_s14 }
  0x1c   : > { %s618_s26 = scalar_lea.vmem %s825_s14, 256  ;;  %p625_p0 = scmp.lt.s32.totalorder %s825_s14, %s623_s30 }
  0x1d   : > { %361 = vmatpush1.bf16.msra.mxu0 %v600_v3  ;;  %p619_p11 = scmp.ne.s32.totalorder %s825_s14, %s618_s26  ;;  %p626_p1 = scmp.lt.s32.totalorder %s624_s6, %s618_s26 }
  0x1e   : > { %362 = vmatprep.subr.bf16.mxu0 %v680_v1 }
  0x1f   : > { %p620_p12 = pnand %p619_p11, %p752_p5  ;;  %p627_p2 = por %p626_p1, %p625_p0 }
  0x21   : > { %363 = vmatpush1.bf16.msra.mxu0 %v601_v4  ;;  %p621_p13 = pneg %p620_p12 }
  0x22   : > { %364 = vmatprep.subr.bf16.mxu0 %v680_v1 }
  0x23   : > { %p628_p3 = pnand %p627_p2, %p621_p13 }
  0x25   : > { %365 = vmatpush1.bf16.msra.mxu0 %v602_v6 }
  0x26   : > { %366 = vmatprep.subr.bf16.mxu0 %v680_v1 }
  0x29   : > { %367 = vmatpush1.bf16.msra.mxu0 %v603_v7 }
  0x2a   : > { %368 = vmatprep.subr.bf16.mxu0 %v680_v1 }
  0x2d   : > { %369 = vmatpush1.bf16.msra.mxu0 %v604_v8 }
  0x2e   : > { %370 = vmatprep.subr.bf16.mxu0 %v680_v1 }
  0x31   : > { %371 = vmatpush1.bf16.msra.mxu0 %v605_v9 }
  0x32   : > { %378 = vmatprep.subr.bf16.mxu0 %v680_v1 }
  0x35   : > { %379 = vmatpush2.bf16.msra.mxu0 %v354_v11 }
  0x36   : > { %380 = vmatprep.subr.bf16.mxu0 %v680_v1 }
  0x39   : > { %381 = vmatpush2.bf16.msra.mxu0 %v607_v12 }
  0x3a   : > { %382 = vmatprep.subr.bf16.mxu0 %v680_v1 }
  0x3d   : > { %383 = vmatpush2.bf16.msra.mxu0 %v608_v13 }
  0x3e   : > { %384 = vmatprep.subr.bf16.mxu0 %v680_v1 }
  0x41   : > { %385 = vmatpush2.bf16.msra.mxu0 %v609_v14 }
  0x42   : > { %386 = vmatprep.subr.bf16.mxu0 %v680_v1 }
  0x45   : > { %387 = vmatpush2.bf16.msra.mxu0 %v610_v15 }
  0x48   : > { %389 = vmatmul.mubr.bf16.vlgmr.msra.gmra.mxu0 %v611_v16 }
 0x108   : > { %v390_v18 = vpop.f32.mrf.mxu0 }
 0x109   : > { %v391_v19 = vadd.f32 %v530_v17, %v390_v18 }
 0x10a   : > { %v392_v20 = vpop.f32.mrf.mxu0 }
 0x10b   : > { %397 = vadd.xlane.f32.xlu0 %v391_v19 }
 0x10c   : > { %v393_v21 = vpop.f32.mrf.mxu0 }
 0x10d   : > { %v394_v22 = vadd.f32 %v530_v17, %v393_v21 }
 0x10e   : > { %v395_v23 = vpop.f32.mrf.mxu0 }
 0x10f   : > { %399 = vadd.xlane.f32.xlu0 %v394_v22 }
 0x194   : > { %v398_v26 = vpop.xlane.xlu0 %397 }
 0x195   : > { %v401_v27 = vmul.f32 0.03125, %v398_v26 }
 0x197   : > { %v406_v28 = vsub.f32 %v391_v19, %v401_v27 }
 0x198   : > { %v400_v29 = vpop.xlane.xlu0 %399 }
 0x199   : > { %v402_v30 = vmul.f32 0.03125, %v400_v29  ;;  %v410_v31 = vsel %vm405_vm2, %v406_v28, 0.0 }
 0x19a   : > { %v412_v32 = vmul.f32 %v410_v31, %v410_v31 }
 0x19b   : > { %v407_v33 = vsub.f32 %v394_v22, %v402_v30 }
 0x19c   : > { %414 = vadd.xlane.f32.xlu1 %v412_v32 }
 0x19d   : > { %v411_v34 = vsel %vm405_vm2, %v407_v33, 0.0 }
 0x19e   : > { %v413_v35 = vmul.f32 %v411_v34, %v411_v34 }
 0x1a0   : > { %416 = vadd.xlane.f32.xlu1 %v413_v35 }
 0x225   : > { %v415_v36 = vpop.xlane.xlu1 %414 }
 0x226   : > { %v418_v37 = vmul.f32 0.03125, %v415_v36 }
 0x228   : > { %v420_v38 = vadd.f32 1e-05, %v418_v37 }
 0x229   : > { %v417_v39 = vpop.xlane.xlu1 %416 }
 0x22a   : > { %614 = vrsqrt.f32 %v420_v38  ;;  %v419_v40 = vmul.f32 0.03125, %v417_v39 }
 0x22c   : > { %v421_v41 = vadd.f32 1e-05, %v419_v40 }
 0x22e   : > { %616 = vrsqrt.f32 %v421_v41 }
 0x237   : > { %v615_v42 = vpop.eup %614 }
 0x238   : > { %v424_v44 = vmul.f32 %v615_v42, %v410_v31 }
 0x23a   : > { %v433_v46 = vmul.f32 %v547_v43, %v424_v44 }
 0x23b   : > { %v617_v47 = vpop.eup %616 }
 0x23c   : > { %v425_v48 = vmul.f32 %v617_v47, %v411_v34  ;;  %v442_v49 = vadd.f32 %v548_v45, %v433_v46 }
 0x23e   : > { %v434_v50 = vmul.f32 %v547_v43, %v425_v48  ;;  %444 = vst [vmem:[%s220_s13] sm:$0xff] %v442_v49 }
 0x240   : > { %v443_v51 = vadd.f32 %v548_v45, %v434_v50 }
 0x242   : > { %445 = vst [vmem:[%s220_s13 + $0x8] sm:$0xff] %v443_v51 }
 0x243   : > { %631 = shalt.err (!%p628_p3)
}
 0x244   : > { %s632_s17 = scalar_lea.hbm %s823_s23, 256  ;;  %s636_s9 = scalar_lea.hbm %s872_s5, 512 }
 0x245   : > { %p633_p4 = scmp.ne.s32.totalorder %s823_s23, %s632_s17  ;;  %p637_p9 = scmp.lt.s32.totalorder %s823_s23, %s872_s5 }
 0x246   : > { %p638_p10 = scmp.lt.s32.totalorder %s636_s9, %s632_s17 }
 0x247   : > { %p634_p7 = pnand %p633_p4, %p752_p5 }
 0x248   : > { %p639_p11 = por %p638_p10, %p637_p9 }
 0x249   : > { %p635_p8 = pneg %p634_p7 }
 0x24b   : > { %p640_p12 = pnand %p639_p11, %p635_p8 }
 0x24d   : > { %643 = shalt.err (!%p640_p12)
}
 0x24e   : > { %s682_s12 = smov 128   ;;  %s683_s13 = smov 8  }
 0x24f   : > { %556 = dma.vmem_to_hbm [thread:$0]  (%p752_p5), %s825_s14, 256, %s823_s23, %s827_s25, %s682_s12, %s682_s12, %s683_s13  }
 0x250 PF: > { %p562_p13 = scmp.ge.s32.totalorder %s678_s21, 2  ;;  %s475_s15 = sand.u32 1, %s666_s18  }
 0x251   : > { %s476_s16 = scalar_lea.sflag [#allocation3], %s475_s15 }
 0x252   : > { %p559_p0 = pnand %p562_p13, %p756_p6 }
 0x254   : > { %p560_p1 = pneg %p559_p0 }
 0x256   : > { %661 = dma.done.wait (%p560_p1), %s476_s16, 256  }
 0x257   : > { %663 = vsyncadd (%p560_p1), %s476_s16, 4294967040  ;;  %p15_p2 = scmp.ge.s32.totalorder %s739_s24, 4   ;;  %s875_s18 = smov %s670_s19 }
 0x258   : > { %s876_s19 = smov %s674_s20  ;;  %s877_s20 = smov %s750_s27 }
 0x259   : > { %s878_s21 = smov %s739_s24  ;;  %17 = sbr.rel (!%p15_p2) target bundleno = 3 (0x3), region = 75 }
 0x25e   :  { %481 = vsyncpa [#allocation3], 1 }
 0x25f   :  { %483 = vsyncpa [#allocation3 + $0x1], 1 }

</bundles_post_ra>
